<compile_context>
chip_gen: v6e
topology: v6e:2x2x1
jax: 0.10.0
libtpu: 0.0.40
codegen_flags: <defaults>
</compile_context>

<pallas_src>
import numpy as np
import jax
import jax.numpy as jnp
from jax.experimental import pallas as pl
from jax.experimental.pallas import tpu as pltpu


def _round_up(x, m):
    return ((x + m - 1) // m) * m


def actor_kernel(x_ref, w1_ref, b1_ref, w2_ref, b2_ref, w3_ref, b3_ref, o_ref):
    # x tile: (TB, state_dim) bf16 (cast in the wrapper).  f32 MXU accumulation.
    x = x_ref[...]

    # layer1 + relu (bias add / relu in f32)
    h1 = jnp.dot(x, w1_ref[...], preferred_element_type=jnp.float32) + b1_ref[...]
    h1 = jnp.maximum(h1, 0.0)

    # layer2 + relu
    h2 = jnp.dot(h1.astype(jnp.bfloat16), w2_ref[...],
                 preferred_element_type=jnp.float32) + b2_ref[...]
    h2 = jnp.maximum(h2, 0.0)

    # layer3 + sigmoid — only the true action_dim columns are computed and
    # stored, so the HBM writeback is just the useful bytes.
    z = jnp.dot(h2.astype(jnp.bfloat16), w3_ref[...],
                preferred_element_type=jnp.float32) + b3_ref[...]
    o_ref[...] = jax.nn.sigmoid(z)


def _choose_batch_tiling(B, tb_max):
    """Balanced batch tiles: TB multiple of 16 (bf16 sublane packing), minimal
    padding, and >= 2 grid steps when there is enough work for 2 TensorCores
    (v7x megacore)."""
    num_tiles = max(1, pl.cdiv(B, tb_max))
    if num_tiles == 1 and B >= 512:
        num_tiles = 2  # let both v7x TensorCores get a tile
    TB = _round_up(pl.cdiv(B, num_tiles), 16)
    B_pad = TB * num_tiles
    return TB, B_pad, num_tiles


def actor_forward(states, params, *, tb_max=1024):
    """states: (B, state_dim) f32 (or bf16). params: dict from init_actor_params."""
    w1, b1 = params["w1"], params["b1"]
    w2, b2 = params["w2"], params["b2"]
    w3, b3 = params["w3"], params["b3"]

    B, state_dim = states.shape
    node1 = w1.shape[1]
    node2 = w2.shape[1]
    action_dim = w3.shape[1]

    TB, B_pad, num_tiles = _choose_batch_tiling(B, tb_max)

    # Cast x to bf16 in the wrapper: halves the x read DMA.
    x = states.astype(jnp.bfloat16)
    if B_pad != B:
        x = jnp.pad(x, ((0, B_pad - B), (0, 0)))
    grid = (num_tiles,)

    # x / output tiled along batch; weights & biases resident across the grid.
    x_spec = pl.BlockSpec((TB, state_dim), lambda i: (i, 0))
    out_spec = pl.BlockSpec((TB, action_dim), lambda i: (i, 0))
    resident = lambda shape: pl.BlockSpec(shape, lambda i: (0, 0))

    flops = 2 * B_pad * (state_dim * node1 + node1 * node2 + node2 * action_dim)
    bytes_accessed = (
        B_pad * state_dim * 2                         # x (bf16)
        + B_pad * action_dim * 4                      # output (f32, un-padded)
        + (state_dim * node1 + node1 * node2 + node2 * action_dim) * 2  # bf16 W
        + (node1 + node2 + action_dim) * 4            # f32 biases
    )
    cost = pl.CostEstimate(
        flops=flops,
        transcendentals=B_pad * action_dim,           # exp in sigmoid
        bytes_accessed=bytes_accessed,
    )

    out_padded = pl.pallas_call(
        actor_kernel,
        out_shape=jax.ShapeDtypeStruct((B_pad, action_dim), jnp.float32),
        grid=grid,
        in_specs=[
            x_spec,
            resident(w1.shape), resident(b1.shape),
            resident(w2.shape), resident(b2.shape),
            resident(w3.shape), resident(b3.shape),
        ],
        out_specs=out_spec,
        compiler_params=pltpu.CompilerParams(
            dimension_semantics=("parallel",),
        ),
        cost_estimate=cost,
    )(x, w1, b1, w2, b2, w3, b3)

    return out_padded[:B]


def init_actor_params(key, state_dim, action_dim, node1, node2):
    """Deterministic 'calibrated' init: randn(out,in)/sqrt(in), zero biases.

    Weights are stored transposed (in, out) and cast to bf16 for the kernel's
    row-major MXU matmuls (f32 accumulation in the kernel)."""
    k1, k2, k3 = jax.random.split(key, 3)

    def calibrated(k, out_f, in_f):
        w = jax.random.normal(k, (out_f, in_f), dtype=jnp.float32) / np.sqrt(in_f)
        return w.T  # (in_f, out_f)

    w1 = calibrated(k1, node1, state_dim)
    w2 = calibrated(k2, node2, node1)
    w3 = calibrated(k3, action_dim, node2)

    return {
        "w1": w1.astype(jnp.bfloat16),
        "b1": jnp.zeros((1, node1), jnp.float32),
        "w2": w2.astype(jnp.bfloat16),
        "b2": jnp.zeros((1, node2), jnp.float32),
        "w3": w3.astype(jnp.bfloat16),
        "b3": jnp.zeros((1, action_dim), jnp.float32),
    }


def actor_reference(states, params):
    """Plain-JAX reference mirroring the kernel's bf16-weight / f32-accum math."""
    x = states.astype(jnp.bfloat16)
    h1 = jnp.dot(x, params["w1"], preferred_element_type=jnp.float32) + params["b1"]
    h1 = jnp.maximum(h1, 0.0)
    h2 = jnp.dot(h1.astype(jnp.bfloat16), params["w2"],
                 preferred_element_type=jnp.float32) + params["b2"]
    h2 = jnp.maximum(h2, 0.0)
    z = jnp.dot(h2.astype(jnp.bfloat16), params["w3"],
                preferred_element_type=jnp.float32) + params["b3"]
    return jax.nn.sigmoid(z)


if __name__ == "__main__":
    key = jax.random.PRNGKey(0)
    k_params, k_x = jax.random.split(key)

    batch = 8
    state_dim = 16
    action_dim = 4
    node1 = 32
    node2 = 32

    params = init_actor_params(k_params, state_dim, action_dim, node1, node2)
    states = jax.random.normal(k_x, (batch, state_dim), dtype=jnp.float32)

    out = actor_forward(states, params)
    out = jax.block_until_ready(out)
    assert out.shape == (batch, action_dim)

    ref = actor_reference(states, params)
    np.testing.assert_allclose(np.asarray(out), np.asarray(ref),
                               rtol=1e-4, atol=1e-4)

    print("KERNEL_OK")
</pallas_src>

<mosaic_0001>
module attributes {stable_mosaic.version = 11 : i64} {
  func.func @actor_kernel(%arg0: i32, %arg1: memref<16x16xbf16, #tpu.memory_space<vmem>>, %arg2: memref<16x32xbf16, #tpu.memory_space<vmem>>, %arg3: memref<1x32xf32, #tpu.memory_space<vmem>>, %arg4: memref<32x32xbf16, #tpu.memory_space<vmem>>, %arg5: memref<1x32xf32, #tpu.memory_space<vmem>>, %arg6: memref<32x4xbf16, #tpu.memory_space<vmem>>, %arg7: memref<1x4xf32, #tpu.memory_space<vmem>>, %arg8: memref<16x4xf32, #tpu.memory_space<vmem>>) attributes {dimension_semantics = [#tpu.dimension_semantics<parallel>], iteration_bounds = array<i64: 1>, scalar_prefetch = 0 : i64, scratch_operands = 0 : i64, tpu.core_type = #tpu.core_type<tc>, window_params = [{transform_indices = @transform_0, window_bounds = array<i64: 16, 16>}, {pipeline_mode = #tpu.pipeline_mode<synchronous>, transform_indices = @transform_1, window_bounds = array<i64: 16, 32>}, {pipeline_mode = #tpu.pipeline_mode<synchronous>, transform_indices = @transform_2, window_bounds = array<i64: 1, 32>}, {pipeline_mode = #tpu.pipeline_mode<synchronous>, transform_indices = @transform_3, window_bounds = array<i64: 32, 32>}, {pipeline_mode = #tpu.pipeline_mode<synchronous>, transform_indices = @transform_4, window_bounds = array<i64: 1, 32>}, {pipeline_mode = #tpu.pipeline_mode<synchronous>, transform_indices = @transform_5, window_bounds = array<i64: 32, 4>}, {pipeline_mode = #tpu.pipeline_mode<synchronous>, transform_indices = @transform_6, window_bounds = array<i64: 1, 4>}, {transform_indices = @transform_7, window_bounds = array<i64: 16, 4>}]} {
    %c0 = arith.constant 0 : index
    %c0_0 = arith.constant 0 : index
    %0 = vector.load %arg1[%c0, %c0_0] : memref<16x16xbf16, #tpu.memory_space<vmem>>, vector<16x16xbf16>
    %c0_1 = arith.constant 0 : index
    %c0_2 = arith.constant 0 : index
    %1 = vector.load %arg2[%c0_1, %c0_2] : memref<16x32xbf16, #tpu.memory_space<vmem>>, vector<16x32xbf16>
    %cst = arith.constant dense<0.000000e+00> : vector<16x32xf32>
    %2 = tpu.matmul %0, %1, %cst {dimension_numbers = #tpu.dot_dimension_numbers<[1], [0], [0], [1], [0, 0, 1, 1], [], []>} : vector<16x16xbf16>, vector<16x32xbf16>, vector<16x32xf32> -> vector<16x32xf32>
    %c0_3 = arith.constant 0 : index
    %c0_4 = arith.constant 0 : index
    %3 = vector.load %arg3[%c0_3, %c0_4] : memref<1x32xf32, #tpu.memory_space<vmem>>, vector<1x32xf32>
    %4 = vector.broadcast %3 : vector<1x32xf32> to vector<16x32xf32>
    %5 = arith.addf %2, %4 : vector<16x32xf32>
    %cst_5 = arith.constant 0.000000e+00 : f32
    %6 = vector.broadcast %cst_5 : f32 to vector<16x32xf32>
    %7 = arith.maximumf %5, %6 : vector<16x32xf32>
    %8 = arith.truncf %7 : vector<16x32xf32> to vector<16x32xbf16>
    %c0_6 = arith.constant 0 : index
    %c0_7 = arith.constant 0 : index
    %9 = vector.load %arg4[%c0_6, %c0_7] : memref<32x32xbf16, #tpu.memory_space<vmem>>, vector<32x32xbf16>
    %cst_8 = arith.constant dense<0.000000e+00> : vector<16x32xf32>
    %10 = tpu.matmul %8, %9, %cst_8 {dimension_numbers = #tpu.dot_dimension_numbers<[1], [0], [0], [1], [0, 0, 1, 1], [], []>} : vector<16x32xbf16>, vector<32x32xbf16>, vector<16x32xf32> -> vector<16x32xf32>
    %c0_9 = arith.constant 0 : index
    %c0_10 = arith.constant 0 : index
    %11 = vector.load %arg5[%c0_9, %c0_10] : memref<1x32xf32, #tpu.memory_space<vmem>>, vector<1x32xf32>
    %12 = vector.broadcast %11 : vector<1x32xf32> to vector<16x32xf32>
    %13 = arith.addf %10, %12 : vector<16x32xf32>
    %cst_11 = arith.constant 0.000000e+00 : f32
    %14 = vector.broadcast %cst_11 : f32 to vector<16x32xf32>
    %15 = arith.maximumf %13, %14 : vector<16x32xf32>
    %16 = arith.truncf %15 : vector<16x32xf32> to vector<16x32xbf16>
    %c0_12 = arith.constant 0 : index
    %c0_13 = arith.constant 0 : index
    %17 = vector.load %arg6[%c0_12, %c0_13] : memref<32x4xbf16, #tpu.memory_space<vmem>>, vector<32x4xbf16>
    %cst_14 = arith.constant dense<0.000000e+00> : vector<16x4xf32>
    %18 = tpu.matmul %16, %17, %cst_14 {dimension_numbers = #tpu.dot_dimension_numbers<[1], [0], [0], [1], [0, 0, 1, 1], [], []>} : vector<16x32xbf16>, vector<32x4xbf16>, vector<16x4xf32> -> vector<16x4xf32>
    %c0_15 = arith.constant 0 : index
    %c0_16 = arith.constant 0 : index
    %19 = vector.load %arg7[%c0_15, %c0_16] : memref<1x4xf32, #tpu.memory_space<vmem>>, vector<1x4xf32>
    %20 = vector.broadcast %19 : vector<1x4xf32> to vector<16x4xf32>
    %21 = arith.addf %18, %20 : vector<16x4xf32>
    %22 = arith.negf %21 : vector<16x4xf32>
    %23 = math.exp %22 : vector<16x4xf32>
    %cst_17 = arith.constant 1.000000e+00 : f32
    %24 = vector.broadcast %cst_17 : f32 to vector<16x4xf32>
    %25 = arith.addf %24, %23 : vector<16x4xf32>
    %26 = arith.divf %24, %25 : vector<16x4xf32>
    %c0_18 = arith.constant 0 : index
    %c0_19 = arith.constant 0 : index
    %27 = vector.load %arg8[%c0_18, %c0_19] : memref<16x4xf32, #tpu.memory_space<vmem>>, vector<16x4xf32>
    tpu.vector_store %arg8[%c0_18, %c0_19], %26 {strides = array<i32>} : memref<16x4xf32, #tpu.memory_space<vmem>>, vector<16x4xf32>,
    return
  }
  func.func @transform_0(%arg0: i32) -> (i32, i32) {
    %c0_i32 = arith.constant 0 : i32
    %c0_i32_0 = arith.constant 0 : i32
    return %arg0, %c0_i32 : i32, i32
  }
  func.func @transform_1(%arg0: i32) -> (i32, i32) {
    %c0_i32 = arith.constant 0 : i32
    %c0_i32_0 = arith.constant 0 : i32
    %c0_i32_1 = arith.constant 0 : i32
    return %c0_i32, %c0_i32_0 : i32, i32
  }
  func.func @transform_2(%arg0: i32) -> (i32, i32) {
    %c0_i32 = arith.constant 0 : i32
    %c0_i32_0 = arith.constant 0 : i32
    %c0_i32_1 = arith.constant 0 : i32
    return %c0_i32, %c0_i32_0 : i32, i32
  }
  func.func @transform_3(%arg0: i32) -> (i32, i32) {
    %c0_i32 = arith.constant 0 : i32
    %c0_i32_0 = arith.constant 0 : i32
    %c0_i32_1 = arith.constant 0 : i32
    return %c0_i32, %c0_i32_0 : i32, i32
  }
  func.func @transform_4(%arg0: i32) -> (i32, i32) {
    %c0_i32 = arith.constant 0 : i32
    %c0_i32_0 = arith.constant 0 : i32
    %c0_i32_1 = arith.constant 0 : i32
    return %c0_i32, %c0_i32_0 : i32, i32
  }
  func.func @transform_5(%arg0: i32) -> (i32, i32) {
    %c0_i32 = arith.constant 0 : i32
    %c0_i32_0 = arith.constant 0 : i32
    %c0_i32_1 = arith.constant 0 : i32
    return %c0_i32, %c0_i32_0 : i32, i32
  }
  func.func @transform_6(%arg0: i32) -> (i32, i32) {
    %c0_i32 = arith.constant 0 : i32
    %c0_i32_0 = arith.constant 0 : i32
    %c0_i32_1 = arith.constant 0 : i32
    return %c0_i32, %c0_i32_0 : i32, i32
  }
  func.func @transform_7(%arg0: i32) -> (i32, i32) {
    %c0_i32 = arith.constant 0 : i32
    %c0_i32_0 = arith.constant 0 : i32
    return %arg0, %c0_i32 : i32, i32
  }
}

</mosaic_0001>

<bundles_post_ra>
// kernel: tpu_custom_call.1
= control target key start
LH: loop header
LB: loop body
LE: loop exit
PB: predicated region body
PF: predicated region fallthrough
CT: control target
= control target key end

     0   :  { %12 = vsyncpa [#allocation3], 0  ;;  %s473_s0 = inlined_call_operand.hbm [shape: bf16[16,16], index: 0, kind: input, shape index: {}]   ;;  %s474_s1 = inlined_call_operand.hbm [shape: bf16[16,32], index: 1, kind: input, shape index: {}]   ;;  %s475_s2 = inlined_call_operand.vmem [shape: f32[1,32], index: 2, kind: input, shape index: {}]   ;;  %s476_s3 = inlined_call_operand.vmem [shape: bf16[32,32], index: 3, kind: input, shape index: {}]   ;;  %s477_s4 = inlined_call_operand.vmem [shape: f32[1,32], index: 4, kind: input, shape index: {}]   ;;  %s478_s5 = inlined_call_operand.vmem [shape: bf16[32,4], index: 5, kind: input, shape index: {}]   ;;  %s479_s6 = inlined_call_operand.vmem [shape: f32[1,4], index: 6, kind: input, shape index: {}]   ;;  %s480_s7 = inlined_call_operand.vmem [shape: f32[16,4], index: 7, kind: output, shape index: {}]  }
   0x1   :  { %13 = vsyncpa [#allocation5], 0  ;;  %s392_s24 = smov [#allocation2]  }
   0x2   :  { %s19_s25 = sshll.u32 %s392_s24, 4  ;;  %s20_s25 = int_to_ptr.vmem [resolvable:$true] %s19_s25 }
   0x3   :  { %s356_s26 = scalar_lea.vmem %s20_s25, 128  ;;  %p361_p1 = scmp.lt.s32.totalorder %s20_s25, %s20_s25 }
   0x4   :  { %p357_p0 = scmp.ne.s32.totalorder %s20_s25, %s356_s26  ;;  %p362_p2 = scmp.lt.s32.totalorder %s356_s26, %s356_s26 }
   0x6   :  { %p363_p3 = por %p362_p2, %p361_p1 }
   0x8   :  { %p364_p4 = pnand %p363_p3, %p357_p0 }
   0xa   :  { %367 = shalt.err (!%p364_p4)
}
   0xb   :  { %s393_s27 = smov 64   ;;  %s394_s28 = smov 4  }
   0xc   :  { %25 = dma.hbm_to_vmem [thread:$0]  %s473_s0, 128, %s20_s25, [#allocation3], %s393_s27, %s393_s27, %s394_s28  }
   0xd   :  { %s395_s8 = smov [#allocation4]  }
   0xe   :  { %s31_s9 = sshll.u32 %s395_s8, 4  ;;  %s32_s9 = int_to_ptr.vmem [resolvable:$true] %s31_s9 }
   0xf   :  { %s376_s10 = scalar_lea.vmem %s32_s9, 128  ;;  %p381_p6 = scmp.lt.s32.totalorder %s32_s9, %s32_s9 }
  0x10   :  { %p377_p5 = scmp.ne.s32.totalorder %s32_s9, %s376_s10  ;;  %p382_p7 = scmp.lt.s32.totalorder %s376_s10, %s376_s10 }
  0x12   :  { %p383_p8 = por %p382_p7, %p381_p6 }
  0x14   :  { %p384_p9 = pnand %p383_p8, %p377_p5 }
  0x16   :  { %387 = shalt.err (!%p384_p9)
}
  0x17   :  { %37 = dma.hbm_to_vmem [thread:$0]  %s474_s1, 128, %s32_s9, [#allocation5], %s393_s27, %s393_s27, %s394_s28  }
  0x18   :  { %388 = dma.done.wait [#allocation3], 128  }
  0x19   :  { %389 = vsyncadd [#allocation3], 4294967168 }
  0x1a   :  { %390 = dma.done.wait [#allocation5], 128  }
  0x1b   :  { %391 = vsyncadd [#allocation5], 4294967168  ;;  %v396_v0 = vmov 0.0   ;;  %vm397_vm0 = vmmov 0   ;;  %v334_v1 = vld [vmem:[#allocation4] sm:$0xff]   ;;  %v335_v2 = vld [vmem:[#allocation2] sm:$0xff]  }
  0x1c   :  { %306 = vmatprep.subr.bf16.mxu0 %v396_v0  ;;  %308 = vmatprep.mubr.msk.bf16.mxu0 %vm397_vm0, %v396_v0  ;;  %vm77_vm1 = vcmask 130048   ;;  %v336_v3 = vld [vmem:[%s476_s3 + $0x8] sm:$0xff]   ;;  %v337_v4 = vld [vmem:[%s476_s3] sm:$0xff]   ;;  %vm148_vm2 = vcmask 261120   ;;  %vm275_vm3 = vcmask 31744  }
  0x1d   :  { %312 = vmatprep.subr.bf16.mxu1 %v396_v0  ;;  %316 = vmatprep.mubr.msk.bf16.mxu1 %vm397_vm0, %v396_v0  ;;  %v284_v5 = vld [vmem:[%s475_s2] ss:$0 sm:$0xff]  ;;  %v338_v15 = vld [vmem:[%s478_s5 + $0x8] sm:$0xff]  }
  0x1e   :  { %307 = vmatpush3.bf16.msra.mxu0 %v334_v1  ;;  %313 = vmatpush3.bf16.msra.mxu1 %v336_v3  ;;  %v339_v16 = vld [vmem:[%s478_s5] sm:$0xff]  }
  0x1f   :  { %320 = vmatprep.subr.bf16.mxu0 %v396_v0  ;;  %314 = vmatprep.subr.bf16.mxu1 %v396_v0  ;;  %v288_v17 = vld [vmem:[%s477_s4] ss:$0 sm:$0xff] }
  0x20   :  { %v292_v27 = vld [vmem:[%s479_s6] ss:$0 sm:$0xff] }
  0x21   :  { %309 = vmatmul.mubr.msk.bf16.vlgmr.msra.gmra.mxu0 %vm77_vm1, %v335_v2 }
  0x22   :  { %324 = vmatprep.mubr.msk.bf16.mxu0 %vm397_vm0, %v396_v0  ;;  %315 = vmatpush3.bf16.msra.mxu1 %v337_v4 }
  0x23   :  { %321 = vmatpush3.bf16.msra.mxu0 %v338_v15 }
  0x24   :  { %322 = vmatprep.subr.bf16.mxu0 %v396_v0 }
  0x27   :  { %323 = vmatpush3.bf16.msra.mxu0 %v339_v16 }
  0xe1   :  { %v115_v6 = vpop.f32.mrf.mxu0 }
  0xe2   :  { %v116_v8 = vadd.f32 %v284_v5, %v115_v6 }
  0xe3   :  { %v310_v7 = vpop.f32.mrf.mxu0 }
  0xe4   :  { %v122_v12 = vmax.f32 %v116_v8, 0.0 }
  0xe5   :  { %v118_v9 = vpop.f32.mrf.mxu0 }
  0xe6   :  { %v119_v10 = vadd.f32 %v284_v5, %v118_v9 }
  0xe7   :  { %v311_v11 = vpop.f32.mrf.mxu0 }
  0xe8   :  { %v123_v13 = vmax.f32 %v119_v10, 0.0 }
  0xea   :  { %v124_v14 = vpack.c.bf16 %v123_v13, %v122_v12 }
  0xec   :  { %317 = vmatmul.mubr.msk.bf16.vlgmr.msra.gmra.mxu1 %vm148_vm2, %v124_v14 }
 0x1ac   :  { %v186_v18 = vpop.f32.mrf.mxu1 }
 0x1ad   :  { %v187_v20 = vadd.f32 %v288_v17, %v186_v18 }
 0x1ae   :  { %v318_v19 = vpop.f32.mrf.mxu1 }
 0x1af   :  { %v193_v24 = vmax.f32 %v187_v20, 0.0 }
 0x1b0   :  { %v189_v21 = vpop.f32.mrf.mxu1 }
 0x1b1   :  { %v190_v22 = vadd.f32 %v288_v17, %v189_v21 }
 0x1b2   :  { %v319_v23 = vpop.f32.mrf.mxu1 }
 0x1b3   :  { %v194_v25 = vmax.f32 %v190_v22, 0.0 }
 0x1b5   :  { %v195_v26 = vpack.c.bf16 %v194_v25, %v193_v24 }
 0x1b7   :  { %325 = vmatmul.mubr.msk.bf16.vlgmr.msra.gmra.mxu0 %vm148_vm2, %v195_v26 }
 0x277   :  { %v256_v28 = vpop.f32.mrf.mxu0 }
 0x278   :  { %v257_v29 = vadd.f32 %v292_v27, %v256_v28 }
 0x279   :  { %v326_v30 = vpop.f32.mrf.mxu0 }
 0x27a   :  { %v296_v31 = vmul.f32 -1.442695, %v257_v29 }
 0x27b   :  { %v259_v32 = vpop.f32.mrf.mxu0 }
 0x27c   :  { %340 = vpow2.f32 %v296_v31  ;;  %v260_v33 = vadd.f32 %v292_v27, %v259_v32 }
 0x27d   :  { %v327_v34 = vpop.f32.mrf.mxu0 }
 0x27e   :  { %v297_v35 = vmul.f32 -1.442695, %v260_v33 }
 0x280   :  { %342 = vpow2.f32 %v297_v35 }
 0x289   :  { %v341_v36 = vpop.eup %340 }
 0x28a   :  { %v269_v37 = vadd.f32 1.0, %v341_v36 }
 0x28c   :  { %344 = vrcp.f32 %v269_v37 }
 0x28d   :  { %v343_v38 = vpop.eup %342 }
 0x28e   :  { %v270_v39 = vadd.f32 1.0, %v343_v38 }
 0x290   :  { %346 = vrcp.f32 %v270_v39 }
 0x299   :  { %v345_v40 = vpop.eup %344 }
 0x29a   :  { %276 = vst.msk [vmem:[%s480_s7] sm:$0xff] %vm275_vm3, %v345_v40 }
 0x29d   :  { %v347_v41 = vpop.eup %346 }
 0x29e   :  { %277 = vst.msk [vmem:[%s480_s7 + $0x8] sm:$0xff] %vm275_vm3, %v347_v41 }
 0x29f   :  { %282 = vsyncpa [#allocation3], 1 }
 0x2a0   :  { %283 = vsyncpa [#allocation5], 1 }

</bundles_post_ra>
